<compile_context>
chip_gen: v6e
topology: v6e:2x2x1
jax: 0.10.0
libtpu: 0.0.40
codegen_flags: <defaults>
</compile_context>

<pallas_src>
import jax
import jax.numpy as jnp
from jax.experimental import pallas as pl
from jax.experimental.pallas import tpu as pltpu


def _test_module_kernel(a_ref, b_ref, c_ref, p_ref, w1t_ref, b1_ref,
                        w2t_ref, b2_ref, add4_ref, add6_ref, relu_ref):
    """Fused TestModule forward.  All refs are small VMEM tiles.

    a/b/c/p        : (N, F) f32
    w1t/w2t        : (F, F) f32, pre-transposed to (in_features, out_features)
    b1/b2          : (1, F) f32
    add4/add6/relu : (N, F) f32 outputs
    """
    f = w1t_ref.shape[0]

    a = a_ref[...]
    add = a + b_ref[...]                      # add   = a + b
    add_1 = add + c_ref[...]                  # add_1 = add + c
    add_2 = add_1 + p_ref[...]                # add_2 = add_1 + param

    # linear_1 = add @ W1^T + b1 as F full-tile outer-product FMAs.
    w1t = w1t_ref[...]
    lin1 = jnp.broadcast_to(b1_ref[...], add.shape)
    for k in range(f):
        lin1 = lin1 + add[:, k:k + 1] * w1t[k:k + 1, :]

    add_3 = add_1 + lin1                      # add_3 = add_1 + linear_1
    add_4 = add_2 + add_3                     # add_4 = add_2 + add_3
    add4_ref[...] = add_4                     # whole-plane store #1

    # linear_2 = add_4 @ W2^T + b2, same outer-product scheme.
    w2t = w2t_ref[...]
    lin2 = jnp.broadcast_to(b2_ref[...], add_4.shape)
    for k in range(f):
        lin2 = lin2 + add_4[:, k:k + 1] * w2t[k:k + 1, :]

    add_5 = lin2 + add_4                      # add_5 = linear_2 + add_4
    add_6 = add_5 + a                         # add_6 = add_5 + a
    add6_ref[...] = add_6                     # whole-plane store #2
    relu_ref[...] = jnp.maximum(add_6, 0.0)   # whole-plane store #3


@jax.jit
def test_module_forward(a, b, c, w1, b1, w2, b2, param):
    """a, b, c: (N, F); w1, w2: (F, F) in PyTorch (out, in) layout;
    b1, b2: (F,); param: (F, F).

    The module's `add_1 + self.param` broadcast requires N == F (== 4).
    """
    n, f = a.shape
    if param.shape != (n, f):
        raise ValueError(
            f"param shape {param.shape} must match activation shape ({n}, {f}); "
            "the PyTorch module's `add_1 + self.param` requires N == 4.")

    vmem = pl.BlockSpec(memory_space=pltpu.MemorySpace.VMEM)
    out_sds = jax.ShapeDtypeStruct((n, f), jnp.float32)

    return pl.pallas_call(
        _test_module_kernel,
        out_shape=(out_sds, out_sds, out_sds),
        in_specs=[vmem] * 8,
        out_specs=(vmem, vmem, vmem),
    )(a, b, c, param,
      # Parameter preprocessing only (constant-foldable in a real deployment):
      w1.T, b1.reshape(1, f),
      w2.T, b2.reshape(1, f))


def _reference(a, b, c, w1, b1, w2, b2, param):
    add = a + b
    linear_1 = add @ w1.T + b1
    add_1 = add + c
    add_2 = add_1 + param
    add_3 = add_1 + linear_1
    add_4 = add_2 + add_3
    linear_2 = add_4 @ w2.T + b2
    add_5 = linear_2 + add_4
    add_6 = add_5 + a
    return add_4, add_6, jnp.maximum(add_6, 0.0)


if __name__ == "__main__":
    key = jax.random.PRNGKey(0)
    ks = jax.random.split(key, 8)
    N, F = 4, 4  # Linear(4, 4); param is (4, 4); the module requires N == 4.

    a = jax.random.normal(ks[0], (N, F), jnp.float32)
    b = jax.random.normal(ks[1], (N, F), jnp.float32)
    c = jax.random.normal(ks[2], (N, F), jnp.float32)

    # Deterministic parameter init (PyTorch-like uniform ranges, synthetic).
    bound = 1.0 / (F ** 0.5)
    w1 = jax.random.uniform(ks[3], (F, F), jnp.float32, -bound, bound)
    b1 = jax.random.uniform(ks[4], (F,), jnp.float32, -bound, bound)
    w2 = jax.random.uniform(ks[5], (F, F), jnp.float32, -bound, bound)
    b2 = jax.random.uniform(ks[6], (F,), jnp.float32, -bound, bound)
    param = jax.random.uniform(ks[7], (F, F), jnp.float32, 0.0, 1.0)

    add_4, add_6, relu = test_module_forward(a, b, c, w1, b1, w2, b2, param)
    jax.block_until_ready((add_4, add_6, relu))

    r4, r6, rr = _reference(a, b, c, w1, b1, w2, b2, param)
    assert jnp.allclose(add_4, r4, atol=1e-5), "add_4 mismatch"
    assert jnp.allclose(add_6, r6, atol=1e-5), "add_6 mismatch"
    assert jnp.allclose(relu, rr, atol=1e-5), "relu mismatch"

    print("KERNEL_OK")
</pallas_src>

<mosaic_0001>
module attributes {stable_mosaic.version = 11 : i64} {
  func.func @_test_module_kernel(%arg0: memref<4x4xf32, #tpu.memory_space<vmem>>, %arg1: memref<4x4xf32, #tpu.memory_space<vmem>>, %arg2: memref<4x4xf32, #tpu.memory_space<vmem>>, %arg3: memref<4x4xf32, #tpu.memory_space<vmem>>, %arg4: memref<4x4xf32, #tpu.memory_space<vmem>>, %arg5: memref<1x4xf32, #tpu.memory_space<vmem>>, %arg6: memref<4x4xf32, #tpu.memory_space<vmem>>, %arg7: memref<1x4xf32, #tpu.memory_space<vmem>>, %arg8: memref<4x4xf32, #tpu.memory_space<vmem>>, %arg9: memref<4x4xf32, #tpu.memory_space<vmem>>, %arg10: memref<4x4xf32, #tpu.memory_space<vmem>>) attributes {dimension_semantics = [], scalar_prefetch = 0 : i64, scratch_operands = 0 : i64, tpu.core_type = #tpu.core_type<tc>} {
    %c0 = arith.constant 0 : index
    %c0_0 = arith.constant 0 : index
    %0 = vector.load %arg0[%c0, %c0_0] : memref<4x4xf32, #tpu.memory_space<vmem>>, vector<4x4xf32>
    %c0_1 = arith.constant 0 : index
    %c0_2 = arith.constant 0 : index
    %1 = vector.load %arg1[%c0_1, %c0_2] : memref<4x4xf32, #tpu.memory_space<vmem>>, vector<4x4xf32>
    %2 = arith.addf %0, %1 : vector<4x4xf32>
    %c0_3 = arith.constant 0 : index
    %c0_4 = arith.constant 0 : index
    %3 = vector.load %arg2[%c0_3, %c0_4] : memref<4x4xf32, #tpu.memory_space<vmem>>, vector<4x4xf32>
    %4 = arith.addf %2, %3 : vector<4x4xf32>
    %c0_5 = arith.constant 0 : index
    %c0_6 = arith.constant 0 : index
    %5 = vector.load %arg3[%c0_5, %c0_6] : memref<4x4xf32, #tpu.memory_space<vmem>>, vector<4x4xf32>
    %6 = arith.addf %4, %5 : vector<4x4xf32>
    %c0_7 = arith.constant 0 : index
    %c0_8 = arith.constant 0 : index
    %7 = vector.load %arg4[%c0_7, %c0_8] : memref<4x4xf32, #tpu.memory_space<vmem>>, vector<4x4xf32>
    %c0_9 = arith.constant 0 : index
    %c0_10 = arith.constant 0 : index
    %8 = vector.load %arg5[%c0_9, %c0_10] : memref<1x4xf32, #tpu.memory_space<vmem>>, vector<1x4xf32>
    %9 = vector.shape_cast %8 : vector<1x4xf32> to vector<1x4xf32>
    %10 = vector.broadcast %9 : vector<1x4xf32> to vector<4x4xf32>
    %11 = vector.extract_strided_slice %2 {offsets = [0, 0], sizes = [4, 1], strides = [1, 1]} : vector<4x4xf32> to vector<4x1xf32>
    %12 = vector.extract_strided_slice %7 {offsets = [0, 0], sizes = [1, 4], strides = [1, 1]} : vector<4x4xf32> to vector<1x4xf32>
    %13 = vector.broadcast %11 : vector<4x1xf32> to vector<4x4xf32>
    %14 = vector.broadcast %12 : vector<1x4xf32> to vector<4x4xf32>
    %15 = arith.mulf %13, %14 : vector<4x4xf32>
    %16 = arith.addf %10, %15 : vector<4x4xf32>
    %17 = vector.extract_strided_slice %2 {offsets = [0, 1], sizes = [4, 1], strides = [1, 1]} : vector<4x4xf32> to vector<4x1xf32>
    %18 = vector.extract_strided_slice %7 {offsets = [1, 0], sizes = [1, 4], strides = [1, 1]} : vector<4x4xf32> to vector<1x4xf32>
    %19 = vector.broadcast %17 : vector<4x1xf32> to vector<4x4xf32>
    %20 = vector.broadcast %18 : vector<1x4xf32> to vector<4x4xf32>
    %21 = arith.mulf %19, %20 : vector<4x4xf32>
    %22 = arith.addf %16, %21 : vector<4x4xf32>
    %23 = vector.extract_strided_slice %2 {offsets = [0, 2], sizes = [4, 1], strides = [1, 1]} : vector<4x4xf32> to vector<4x1xf32>
    %24 = vector.extract_strided_slice %7 {offsets = [2, 0], sizes = [1, 4], strides = [1, 1]} : vector<4x4xf32> to vector<1x4xf32>
    %25 = vector.broadcast %23 : vector<4x1xf32> to vector<4x4xf32>
    %26 = vector.broadcast %24 : vector<1x4xf32> to vector<4x4xf32>
    %27 = arith.mulf %25, %26 : vector<4x4xf32>
    %28 = arith.addf %22, %27 : vector<4x4xf32>
    %29 = vector.extract_strided_slice %2 {offsets = [0, 3], sizes = [4, 1], strides = [1, 1]} : vector<4x4xf32> to vector<4x1xf32>
    %30 = vector.extract_strided_slice %7 {offsets = [3, 0], sizes = [1, 4], strides = [1, 1]} : vector<4x4xf32> to vector<1x4xf32>
    %31 = vector.broadcast %29 : vector<4x1xf32> to vector<4x4xf32>
    %32 = vector.broadcast %30 : vector<1x4xf32> to vector<4x4xf32>
    %33 = arith.mulf %31, %32 : vector<4x4xf32>
    %34 = arith.addf %28, %33 : vector<4x4xf32>
    %35 = arith.addf %4, %34 : vector<4x4xf32>
    %36 = arith.addf %6, %35 : vector<4x4xf32>
    %c0_11 = arith.constant 0 : index
    %c0_12 = arith.constant 0 : index
    %37 = vector.load %arg8[%c0_11, %c0_12] : memref<4x4xf32, #tpu.memory_space<vmem>>, vector<4x4xf32>
    tpu.vector_store %arg8[%c0_11, %c0_12], %36 {strides = array<i32>} : memref<4x4xf32, #tpu.memory_space<vmem>>, vector<4x4xf32>,
    %c0_13 = arith.constant 0 : index
    %c0_14 = arith.constant 0 : index
    %38 = vector.load %arg6[%c0_13, %c0_14] : memref<4x4xf32, #tpu.memory_space<vmem>>, vector<4x4xf32>
    %c0_15 = arith.constant 0 : index
    %c0_16 = arith.constant 0 : index
    %39 = vector.load %arg7[%c0_15, %c0_16] : memref<1x4xf32, #tpu.memory_space<vmem>>, vector<1x4xf32>
    %40 = vector.shape_cast %39 : vector<1x4xf32> to vector<1x4xf32>
    %41 = vector.broadcast %40 : vector<1x4xf32> to vector<4x4xf32>
    %42 = vector.extract_strided_slice %36 {offsets = [0, 0], sizes = [4, 1], strides = [1, 1]} : vector<4x4xf32> to vector<4x1xf32>
    %43 = vector.extract_strided_slice %38 {offsets = [0, 0], sizes = [1, 4], strides = [1, 1]} : vector<4x4xf32> to vector<1x4xf32>
    %44 = vector.broadcast %42 : vector<4x1xf32> to vector<4x4xf32>
    %45 = vector.broadcast %43 : vector<1x4xf32> to vector<4x4xf32>
    %46 = arith.mulf %44, %45 : vector<4x4xf32>
    %47 = arith.addf %41, %46 : vector<4x4xf32>
    %48 = vector.extract_strided_slice %36 {offsets = [0, 1], sizes = [4, 1], strides = [1, 1]} : vector<4x4xf32> to vector<4x1xf32>
    %49 = vector.extract_strided_slice %38 {offsets = [1, 0], sizes = [1, 4], strides = [1, 1]} : vector<4x4xf32> to vector<1x4xf32>
    %50 = vector.broadcast %48 : vector<4x1xf32> to vector<4x4xf32>
    %51 = vector.broadcast %49 : vector<1x4xf32> to vector<4x4xf32>
    %52 = arith.mulf %50, %51 : vector<4x4xf32>
    %53 = arith.addf %47, %52 : vector<4x4xf32>
    %54 = vector.extract_strided_slice %36 {offsets = [0, 2], sizes = [4, 1], strides = [1, 1]} : vector<4x4xf32> to vector<4x1xf32>
    %55 = vector.extract_strided_slice %38 {offsets = [2, 0], sizes = [1, 4], strides = [1, 1]} : vector<4x4xf32> to vector<1x4xf32>
    %56 = vector.broadcast %54 : vector<4x1xf32> to vector<4x4xf32>
    %57 = vector.broadcast %55 : vector<1x4xf32> to vector<4x4xf32>
    %58 = arith.mulf %56, %57 : vector<4x4xf32>
    %59 = arith.addf %53, %58 : vector<4x4xf32>
    %60 = vector.extract_strided_slice %36 {offsets = [0, 3], sizes = [4, 1], strides = [1, 1]} : vector<4x4xf32> to vector<4x1xf32>
    %61 = vector.extract_strided_slice %38 {offsets = [3, 0], sizes = [1, 4], strides = [1, 1]} : vector<4x4xf32> to vector<1x4xf32>
    %62 = vector.broadcast %60 : vector<4x1xf32> to vector<4x4xf32>
    %63 = vector.broadcast %61 : vector<1x4xf32> to vector<4x4xf32>
    %64 = arith.mulf %62, %63 : vector<4x4xf32>
    %65 = arith.addf %59, %64 : vector<4x4xf32>
    %66 = arith.addf %65, %36 : vector<4x4xf32>
    %67 = arith.addf %66, %0 : vector<4x4xf32>
    %c0_17 = arith.constant 0 : index
    %c0_18 = arith.constant 0 : index
    %68 = vector.load %arg9[%c0_17, %c0_18] : memref<4x4xf32, #tpu.memory_space<vmem>>, vector<4x4xf32>
    tpu.vector_store %arg9[%c0_17, %c0_18], %67 {strides = array<i32>} : memref<4x4xf32, #tpu.memory_space<vmem>>, vector<4x4xf32>,
    %cst = arith.constant 0.000000e+00 : f32
    %69 = vector.broadcast %cst : f32 to vector<4x4xf32>
    %70 = arith.maximumf %67, %69 : vector<4x4xf32>
    %c0_19 = arith.constant 0 : index
    %c0_20 = arith.constant 0 : index
    %71 = vector.load %arg10[%c0_19, %c0_20] : memref<4x4xf32, #tpu.memory_space<vmem>>, vector<4x4xf32>
    tpu.vector_store %arg10[%c0_19, %c0_20], %70 {strides = array<i32>} : memref<4x4xf32, #tpu.memory_space<vmem>>, vector<4x4xf32>,
    return
  }
}

</mosaic_0001>

<bundles_post_ra>
// kernel: test_module_forward.1
= control target key start
LH: loop header
LB: loop body
LE: loop exit
PB: predicated region body
PF: predicated region fallthrough
CT: control target
= control target key end

     0   :  { %16 = vsyncpa [#allocation3], 0  ;;  %v269_v2 = vmov 0   ;;  %v270_v4 = vmov 2   ;;  %s371_s0 = inlined_call_operand.vmem [shape: f32[4,4], index: 0, kind: input, shape index: {}]   ;;  %s372_s1 = inlined_call_operand.vmem [shape: f32[4,4], index: 1, kind: input, shape index: {}]   ;;  %s373_s2 = inlined_call_operand.vmem [shape: f32[4,4], index: 2, kind: input, shape index: {}]   ;;  %s374_s3 = inlined_call_operand.vmem [shape: f32[4,4], index: 3, kind: input, shape index: {}]   ;;  %s375_s4 = inlined_call_operand.vmem [shape: f32[4,4], index: 4, kind: input, shape index: {}]   ;;  %s376_s5 = inlined_call_operand.vmem [shape: f32[1,4], index: 5, kind: input, shape index: {}]   ;;  %s377_s6 = inlined_call_operand.vmem [shape: f32[4,4], index: 6, kind: input, shape index: {}]   ;;  %s378_s7 = inlined_call_operand.vmem [shape: f32[1,4], index: 7, kind: input, shape index: {}]   ;;  %s379_s8 = inlined_call_operand.hbm [shape: f32[4,4], index: 8, kind: output, shape index: {0}]   ;;  %s380_s9 = inlined_call_operand.hbm [shape: f32[4,4], index: 9, kind: output, shape index: {1}]   ;;  %s381_s10 = inlined_call_operand.hbm [shape: f32[4,4], index: 10, kind: output, shape index: {2}]  }
   0x1   :  { %v334_v0 = vld [vmem:[%s371_s0] sm:$0xf]  ;;  %198 = vset.pattern.permute.xlu0 %v269_v2  ;;  %200 = vset.pattern.permute.xlu1 %v270_v4 }
   0x2   :  { %v35_v1 = vld [vmem:[%s372_s1] sm:$0xf] }
   0x3   :  { %v36_v3 = vadd.f32 %v35_v1, %v334_v0 }
   0x4   :  { %17 = vsyncpa [#allocation5], 0  ;;  %v271_v5 = vmov 1   ;;  %v272_v6 = vmov 3   ;;  %v54_v7 = vlaneseq  ;;  %v41_v10 = vld [vmem:[%s375_s4] sm:$0xf] }
   0x5   :  { %51 = vperm.xlu0 %198, %v36_v3   ;;  %71 = vperm.xlu1 %200, %v36_v3   ;;  %v189_v19 = vld [vmem:[%s376_s5] ss:$0 sm:$0xff]  ;;  %vm92_vm0 = vcmask 27648  }
   0x6   :  { %v55_v8 = vshrl.u32 %v54_v7, 7  ;;  %v37_v23 = vld [vmem:[%s373_s2] sm:$0xf]  ;;  %s273_s2 = smov [#allocation2]  }
   0x7   :  { %v38_v29 = vadd.f32 %v37_v23, %v36_v3  ;;  %v39_v31 = vld [vmem:[%s374_s3] sm:$0xf]  ;;  %s154_s5 = sshll.u32 %s273_s2, 4  ;;  %s155_s5 = int_to_ptr.vmem [resolvable:$true] %s154_s5 }
   0x8   :  { %v56_v9 = vsub.s32 0, %v55_v8  ;;  %v66_v12 = vsub.s32 1, %v55_v8  ;;  %v76_v14 = vsub.s32 2, %v55_v8  ;;  %v86_v16 = vsub.s32 3, %v55_v8  ;;  %s205_s22 = scalar_lea.vmem %s155_s5, 64  ;;  %p210_p1 = scmp.lt.s32.totalorder %s155_s5, %s155_s5 }
   0x9   :  { %199 = vset.pattern.permute.xlu0 %v271_v5  ;;  %201 = vset.pattern.permute.xlu1 %v272_v6  ;;  %v40_v33 = vadd.f32 %v39_v31, %v38_v29  ;;  %p206_p0 = scmp.ne.s32.totalorder %s155_s5, %s205_s22  ;;  %p211_p2 = scmp.lt.s32.totalorder %s205_s22, %s205_s22 }
   0xa   :  { %61 = vperm.xlu0 %199, %v36_v3   ;;  %81 = vperm.xlu1 %201, %v36_v3   ;;  %v57_v11 = vrot.slane %v41_v10, %v56_v9  ;;  %v67_v18 = vrot.slane %v41_v10, %v66_v12  ;;  %v77_v20 = vrot.slane %v41_v10, %v76_v14 }
   0xb   :  { %v87_v21 = vrot.slane %v41_v10, %v86_v16  ;;  %p212_p3 = por %p211_p2, %p210_p1 }
   0xd   :  { %p213_p4 = pnand %p212_p3, %p206_p0 }
   0xe   :  { %202 = vset.pattern.permute.xlu1 %v269_v2 }
  0x80   :  { %v52_v13 = vpop.permute.xlu0 %51  ;;  %v72_v15 = vpop.permute.xlu1 %71 }
  0x81   :  { %v58_v17 = vmul.f32 %v57_v11, %v52_v13  ;;  %v78_v27 = vmul.f32 %v77_v20, %v72_v15 }
  0x83   :  { %v59_v25 = vadd.f32 %v189_v19, %v58_v17 }
  0x85   :  { %v62_v22 = vpop.permute.xlu0 %61  ;;  %v82_v24 = vpop.permute.xlu1 %81 }
  0x86   :  { %v68_v26 = vmul.f32 %v67_v18, %v62_v22  ;;  %v88_v30 = vmul.f32 %v87_v21, %v82_v24 }
  0x88   :  { %v69_v28 = vadd.f32 %v68_v26, %v59_v25 }
  0x8a   :  { %v79_v32 = vadd.f32 %v78_v27, %v69_v28 }
  0x8c   :  { %v89_v34 = vadd.f32 %v88_v30, %v79_v32 }
  0x8e   :  { %v90_v35 = vadd.f32 %v89_v34, %v38_v29 }
  0x90   :  { %v91_v36 = vadd.f32 %v90_v35, %v40_v33 }
  0x92   :  { %114 = vperm.xlu0 %199, %v91_v36   ;;  %104 = vperm.xlu1 %202, %v91_v36   ;;  %93 = vst.msk [vmem:[#allocation2] sm:$0xf] %vm92_vm0, %v91_v36 }
  0x96   :  { %204 = vset.pattern.permute.xlu0 %v272_v6  ;;  %203 = vset.pattern.permute.xlu1 %v270_v4 }
  0x97   :  { %134 = vperm.xlu0 %204, %v91_v36   ;;  %124 = vperm.xlu1 %203, %v91_v36  }
  0x98   :  { %216 = shalt.err (!%p213_p4)
}
  0x99   :  { %157 = dma.vmem_to_hbm [thread:$0]  %s155_s5, 64, %s379_s8, [#allocation3]   ;;  %v94_v37 = vld [vmem:[%s377_s6] sm:$0xf] }
  0x9a   :  { %v110_v38 = vrot.slane %v94_v37, %v56_v9  ;;  %v120_v39 = vrot.slane %v94_v37, %v66_v12  ;;  %v190_v41 = vld [vmem:[%s378_s7] ss:$0 sm:$0xff]  ;;  %v130_v44 = vrot.slane %v94_v37, %v76_v14  ;;  %v140_v47 = vrot.slane %v94_v37, %v86_v16  ;;  %s274_s6 = smov [#allocation4]   ;;  %s275_s28 = smov [#allocation6]  }
  0x9b   :  { %s164_s8 = sshll.u32 %s274_s6, 4  ;;  %s174_s29 = sshll.u32 %s275_s28, 4  ;;  %s165_s8 = int_to_ptr.vmem [resolvable:$true] %s164_s8  ;;  %s175_s29 = int_to_ptr.vmem [resolvable:$true] %s174_s29 }
  0x9c   :  { %s225_s7 = scalar_lea.vmem %s165_s8, 64  ;;  %p230_p6 = scmp.lt.s32.totalorder %s165_s8, %s165_s8 }
  0x9d   :  { %p226_p5 = scmp.ne.s32.totalorder %s165_s8, %s225_s7  ;;  %p231_p7 = scmp.lt.s32.totalorder %s225_s7, %s225_s7 }
  0x9f   :  { %p232_p8 = por %p231_p7, %p230_p6 }
  0xa1   :  { %p233_p9 = pnand %p232_p8, %p226_p5 }
 0x10d   :  { %v115_v40 = vpop.permute.xlu0 %114  ;;  %v105_v42 = vpop.permute.xlu1 %104 }
 0x10e   :  { %v111_v43 = vmul.f32 %v110_v38, %v105_v42  ;;  %v121_v45 = vmul.f32 %v120_v39, %v115_v40 }
 0x110   :  { %v112_v46 = vadd.f32 %v190_v41, %v111_v43 }
 0x112   :  { %v135_v48 = vpop.permute.xlu0 %134  ;;  %v122_v49 = vadd.f32 %v121_v45, %v112_v46  ;;  %v125_v50 = vpop.permute.xlu1 %124 }
 0x113   :  { %v131_v51 = vmul.f32 %v130_v44, %v125_v50  ;;  %v141_v52 = vmul.f32 %v140_v47, %v135_v48 }
 0x115   :  { %v132_v53 = vadd.f32 %v131_v51, %v122_v49 }
 0x117   :  { %v142_v54 = vadd.f32 %v141_v52, %v132_v53 }
 0x119   :  { %v143_v55 = vadd.f32 %v142_v54, %v91_v36 }
 0x11b   :  { %v144_v56 = vadd.f32 %v143_v55, %v334_v0 }
 0x11d   :  { %145 = vst.msk [vmem:[#allocation4] sm:$0xf] %vm92_vm0, %v144_v56  ;;  %v146_v57 = vmax.f32 %v144_v56, 0.0 }
 0x11e   :  { %236 = shalt.err (!%p233_p9)
}
 0x11f   :  { %167 = dma.vmem_to_hbm [thread:$0]  %s165_s8, 64, %s380_s9, [#allocation5]   ;;  %147 = vst.msk [vmem:[#allocation6] sm:$0xf] %vm92_vm0, %v146_v57 }
 0x120   :  { %s245_s12 = scalar_lea.vmem %s175_s29, 64  ;;  %p250_p11 = scmp.lt.s32.totalorder %s175_s29, %s175_s29 }
 0x121   :  { %p246_p10 = scmp.ne.s32.totalorder %s175_s29, %s245_s12  ;;  %p251_p12 = scmp.lt.s32.totalorder %s245_s12, %s245_s12 }
 0x123   :  { %p252_p13 = por %p251_p12, %p250_p11 }
 0x125   :  { %p253_p0 = pnand %p252_p13, %p246_p10 }
 0x127   :  { %256 = shalt.err (!%p253_p0)
}
 0x128   :  { %177 = dma.vmem_to_hbm [thread:$0]  %s175_s29, 64, %s381_s10, [#allocation5]  }
 0x129   :  { %265 = dma.done.wait [#allocation3], 64  }
 0x12a   :  { %266 = vsyncadd [#allocation3], 4294967232 }
 0x12b   :  { %267 = dma.done.wait [#allocation5], 128  }
 0x12c   :  { %268 = vsyncadd [#allocation5], 4294967168 }
 0x12d   :  { %187 = vsyncpa [#allocation3], 1 }
 0x12e   :  { %188 = vsyncpa [#allocation5], 1 }

</bundles_post_ra>
